<compile_context>
chip_gen: v7x
topology: tpu7x:2x2x1
jax: 0.10.0
libtpu: 0.0.40
codegen_flags: <defaults>
</compile_context>

<pallas_src>
import math

import jax
import jax.numpy as jnp
import numpy as np
from jax.experimental import pallas as pl
from jax.experimental.pallas import tpu as pltpu


def _round_up(v, m):
    return ((v + m - 1) // m) * m


def _vmem_tile_bytes(shape, itemsize):
    """Approx VMEM footprint of one buffered block (lane/sublane padded)."""
    dims = list(shape)
    dims[-1] = _round_up(dims[-1], 128)
    if len(dims) >= 2:
        dims[-2] = _round_up(dims[-2], 8)
    n = 1
    for s in dims:
        n *= int(s)
    return n * itemsize


def _physical_vmem_bytes():
    try:
        info = pltpu.get_tpu_info()
        for attr in ("vmem_capacity_bytes", "vmem_bytes", "vmem_size_bytes"):
            v = getattr(info, attr, None)
            if v:
                return int(v)
    except Exception:
        pass
    return 64 << 20  # v7x-safe fallback (smallest per-TC VMEM across v5e/v6e/v7x)


def _make_kernel(K, d, pad, P, TL, C_in, C_out, has_downsample, multi_tile):
    def kernel(x_ref, w1_ref, b1_ref, w2_ref, b2_ref, *rest):
        if has_downsample:
            wd_ref, bd_ref, o_ref, xp_ref, h1p_ref = rest
        else:
            o_ref, xp_ref, h1p_ref = rest

        lt = pl.program_id(1)
        xcur = x_ref[0]                                  # (C_in, TL), input dtype

        # ---- left halo of `pad` columns kept just below the 128-aligned
        #      offset P so the big (C, TL) scratch stores stay unmasked ----
        if pad > 0:
            @pl.when(lt == 0)
            def _():
                xp_ref[:, P - pad:P] = jnp.zeros((C_in, pad), xp_ref.dtype)
                h1p_ref[:, P - pad:P] = jnp.zeros((C_out, pad), h1p_ref.dtype)

            if multi_tile:
                @pl.when(lt > 0)
                def _():
                    # tails of the previous tile become the new halo
                    xp_ref[:, P - pad:P] = xp_ref[:, P + TL - pad:P + TL]
                    h1p_ref[:, P - pad:P] = h1p_ref[:, P + TL - pad:P + TL]

        xp_ref[:, P:] = xcur.astype(xp_ref.dtype)        # lane-aligned store

        # ---- conv1 (dilated): K per-tap matmuls accumulated in f32 ----
        h1 = jnp.dot(w1_ref[0], xp_ref[:, P - pad:P - pad + TL],
                     preferred_element_type=jnp.float32)
        for k in range(1, K):
            off = P - pad + k * d
            h1 = h1 + jnp.dot(w1_ref[k], xp_ref[:, off:off + TL],
                              preferred_element_type=jnp.float32)
        h1 = jnp.maximum(h1 + b1_ref[...], 0.0)          # relu1; drop1 = identity
        h1p_ref[:, P:] = h1.astype(h1p_ref.dtype)        # lane-aligned store

        # ---- conv2 (dilated): same pattern on h1 ----
        out2 = jnp.dot(w2_ref[0], h1p_ref[:, P - pad:P - pad + TL],
                       preferred_element_type=jnp.float32)
        for k in range(1, K):
            off = P - pad + k * d
            out2 = out2 + jnp.dot(w2_ref[k], h1p_ref[:, off:off + TL],
                                  preferred_element_type=jnp.float32)
        out2 = jnp.maximum(out2 + b2_ref[...], 0.0)      # relu2; drop2 = identity

        # ---- residual ----
        if has_downsample:
            res = jnp.dot(wd_ref[...], xcur.astype(wd_ref.dtype),
                          preferred_element_type=jnp.float32) + bd_ref[...]
        else:
            res = xcur.astype(jnp.float32)               # exact identity residual

        o_ref[0] = (out2 + res).astype(o_ref.dtype)

    return kernel


def temporal_block_forward(x, params, kernel_size, dilation,
                           *, time_tile=None, compute_dtype=jnp.float32):
    """x: (N, C_in, L) float32 (PyTorch NCL). Returns (N, C_out, L)."""
    w1, b1, w2, b2, wd, bd = params                      # PyTorch conv weights (O, I, K)
    N, C_in, L = x.shape
    C_out = w1.shape[0]
    K, d = kernel_size, dilation
    pad = (K - 1) * d
    P = _round_up(pad, 128) if pad > 0 else 0            # lane-aligned tile offset

    has_downsample = wd is not None
    if not has_downsample and C_in != C_out:
        raise ValueError("identity residual requires C_in == C_out")

    cdt = compute_dtype
    xsz = jnp.dtype(x.dtype).itemsize
    csz = jnp.dtype(cdt).itemsize

    def vmem_estimate(TL):
        est = 0
        # double-buffered input / output blocks
        est += 2 * _vmem_tile_bytes((1, C_in, TL), xsz)
        est += 2 * _vmem_tile_bytes((1, C_out, TL), xsz)
        # constant weight / bias blocks (pipeline still reserves 2 buffers each)
        est += 2 * (_vmem_tile_bytes((K, C_out, C_in), csz)
                    + _vmem_tile_bytes((K, C_out, C_out), csz)
                    + 2 * _vmem_tile_bytes((C_out, 1), 4))
        if has_downsample:
            est += 2 * (_vmem_tile_bytes((C_out, C_in), csz)
                        + _vmem_tile_bytes((C_out, 1), 4))
        # persistent halo scratch
        est += _vmem_tile_bytes((C_in, P + TL), csz)
        est += _vmem_tile_bytes((C_out, P + TL), csz)
        # in-body f32 temporaries (h1, out2, res, casts)
        est += (4 * C_out + 2 * C_in) * _round_up(TL, 128) * 4
        return est

    phys = _physical_vmem_bytes()
    cap = min(phys * 5 // 8, 96 << 20)     # ~40 MiB on v7x, ~80 MiB on v5e/v6e
    budget = int(cap * 0.75)

    # ---- time-tile selection (128-multiples; pad L up instead of TL = L) ----
    if time_tile is not None:
        TL = int(time_tile)
    elif L <= 512:
        TL = L                              # single tile: block == full dim is legal
    else:
        min_tl = max(128, _round_up(pad, 128))
        cands = [c for c in (2048, 1024, 512, 384, 256, 128)
                 if min_tl <= c <= max(min_tl, _round_up(L, 128))]
        if not cands:
            cands = [min_tl]
        fitting = [c for c in cands if vmem_estimate(c) <= budget] or [cands[-1]]
        # least end-padding first, then the biggest tile
        TL = min(fitting, key=lambda c: (_round_up(L, c), -c))

    Lp = _round_up(L, TL)
    nLt = Lp // TL
    if nLt > 1 and TL < pad:
        raise ValueError("time tile must cover the (K-1)*dilation halo")

    est = vmem_estimate(TL)
    vmem_limit = int(min(max(int(est * 1.5), 16 << 20), cap))

    xin = x if Lp == L else jnp.pad(x, ((0, 0), (0, 0), (0, Lp - L)))

    # per-tap weights: w1k[k, o, i] = w1[o, i, k]
    w1k = jnp.transpose(w1, (2, 0, 1)).astype(cdt)       # (K, C_out, C_in)
    w2k = jnp.transpose(w2, (2, 0, 1)).astype(cdt)       # (K, C_out, C_out)
    b1c = b1.reshape(C_out, 1).astype(jnp.float32)
    b2c = b2.reshape(C_out, 1).astype(jnp.float32)

    in_specs = [
        pl.BlockSpec((1, C_in, TL), lambda b, t: (b, 0, t)),
        pl.BlockSpec((K, C_out, C_in), lambda b, t: (0, 0, 0)),
        pl.BlockSpec((C_out, 1), lambda b, t: (0, 0)),
        pl.BlockSpec((K, C_out, C_out), lambda b, t: (0, 0, 0)),
        pl.BlockSpec((C_out, 1), lambda b, t: (0, 0)),
    ]
    args = [xin, w1k, b1c, w2k, b2c]
    if has_downsample:
        wdc = wd[:, :, 0].astype(cdt)                    # (C_out, C_in)
        bdc = bd.reshape(C_out, 1).astype(jnp.float32)
        in_specs += [pl.BlockSpec((C_out, C_in), lambda b, t: (0, 0)),
                     pl.BlockSpec((C_out, 1), lambda b, t: (0, 0))]
        args += [wdc, bdc]

    kernel = _make_kernel(K, d, pad, P, TL, C_in, C_out, has_downsample, nLt > 1)

    out = pl.pallas_call(
        kernel,
        out_shape=jax.ShapeDtypeStruct((N, C_out, Lp), x.dtype),
        grid_spec=pltpu.PrefetchScalarGridSpec(
            num_scalar_prefetch=0,
            grid=(N, nLt),
            in_specs=in_specs,
            out_specs=pl.BlockSpec((1, C_out, TL), lambda b, t: (b, 0, t)),
            scratch_shapes=[pltpu.VMEM((C_in, P + TL), cdt),
                            pltpu.VMEM((C_out, P + TL), cdt)],
        ),
        compiler_params=pltpu.CompilerParams(
            dimension_semantics=("parallel", "arbitrary"),
            vmem_limit_bytes=vmem_limit),
    )(*args)

    if Lp != L:
        out = out[..., :L]
    return out


def ref_temporal_block(x, w1, b1, w2, b2, wd, bd, dilation):
    """Pure-JAX reference matching torch.nn semantics (eval mode)."""
    pad = (w1.shape[2] - 1) * dilation

    def conv(x, w, b, dil, p):
        y = jax.lax.conv_general_dilated(
            x, w, window_strides=(1,), padding=[(p, p)], rhs_dilation=(dil,),
            dimension_numbers=("NCH", "OIH", "NCH"))
        return y + b[None, :, None]

    h = jax.nn.relu(conv(x, w1, b1, dilation, pad))
    o = jax.nn.relu(conv(h, w2, b2, dilation, pad))
    res = x if wd is None else conv(x, wd, bd, 1, 0)
    return o[..., : x.shape[2]] + res


if __name__ == "__main__":
    N, C_in, C_out, L = 2, 4, 8, 16
    K, d = 3, 2

    key = jax.random.PRNGKey(0)
    ks = jax.random.split(key, 9)
    s1 = 1.0 / math.sqrt(C_in * K)
    s2 = 1.0 / math.sqrt(C_out * K)
    sd = 1.0 / math.sqrt(C_in)
    w1 = jax.random.uniform(ks[0], (C_out, C_in, K), jnp.float32, -s1, s1)
    b1 = jax.random.uniform(ks[1], (C_out,), jnp.float32, -s1, s1)
    w2 = jax.random.uniform(ks[2], (C_out, C_out, K), jnp.float32, -s2, s2)
    b2 = jax.random.uniform(ks[3], (C_out,), jnp.float32, -s2, s2)
    wd = jax.random.uniform(ks[4], (C_out, C_in, 1), jnp.float32, -sd, sd)
    bd = jax.random.uniform(ks[5], (C_out,), jnp.float32, -sd, sd)
    x = jax.random.normal(ks[6], (N, C_in, L), jnp.float32)

    # 1) f32, single time tile, downsample residual
    out = temporal_block_forward(x, (w1, b1, w2, b2, wd, bd), K, d)
    out = jax.block_until_ready(out)
    assert out.shape == (N, C_out, L)
    ref = ref_temporal_block(x, w1, b1, w2, b2, wd, bd, d)
    np.testing.assert_allclose(np.asarray(out), np.asarray(ref),
                               rtol=1e-5, atol=1e-5)

    # 2) multi-tile time axis (exercises the lane-aligned halo carry)
    L2 = 256
    x2 = jax.random.normal(ks[7], (N, C_in, L2), jnp.float32)
    out2 = temporal_block_forward(x2, (w1, b1, w2, b2, wd, bd), K, d,
                                  time_tile=128)
    out2 = jax.block_until_ready(out2)
    ref2 = ref_temporal_block(x2, w1, b1, w2, b2, wd, bd, d)
    np.testing.assert_allclose(np.asarray(out2), np.asarray(ref2),
                               rtol=1e-5, atol=1e-5)

    # 3) identity residual path (C_in == C_out, no downsample conv)
    w1i = jax.random.uniform(ks[0], (C_out, C_out, K), jnp.float32, -s2, s2)
    xi = jax.random.normal(ks[6], (N, C_out, L), jnp.float32)
    outi = temporal_block_forward(xi, (w1i, b1, w2, b2, None, None), K, d)
    outi = jax.block_until_ready(outi)
    refi = ref_temporal_block(xi, w1i, b1, w2, b2, None, None, d)
    np.testing.assert_allclose(np.asarray(outi), np.asarray(refi),
                               rtol=1e-5, atol=1e-5)

    # 4) bf16 MXU operands, f32 accumulation (looser tolerance)
    outb = temporal_block_forward(x, (w1, b1, w2, b2, wd, bd), K, d,
                                  compute_dtype=jnp.bfloat16)
    outb = jax.block_until_ready(outb)
    np.testing.assert_allclose(np.asarray(outb), np.asarray(ref),
                               rtol=5e-2, atol=5e-2)

    # 5) long awkward L (> 512, not a 128 multiple) -> wrapper pads / slices
    L3 = 600
    x3 = jax.random.normal(ks[8], (N, C_in, L3), jnp.float32)
    out3 = temporal_block_forward(x3, (w1, b1, w2, b2, wd, bd), K, d)
    out3 = jax.block_until_ready(out3)
    ref3 = ref_temporal_block(x3, w1, b1, w2, b2, wd, bd, d)
    np.testing.assert_allclose(np.asarray(out3), np.asarray(ref3),
                               rtol=1e-5, atol=1e-5)

    print("KERNEL_OK")
</pallas_src>

<mosaic_0001>
module attributes {stable_mosaic.version = 11 : i64} {
  func.func @kernel(%arg0: i32, %arg1: i32, %arg2: memref<1x4x16xf32, #tpu.memory_space<vmem>>, %arg3: memref<3x8x4xf32, #tpu.memory_space<vmem>>, %arg4: memref<8x1xf32, #tpu.memory_space<vmem>>, %arg5: memref<3x8x8xf32, #tpu.memory_space<vmem>>, %arg6: memref<8x1xf32, #tpu.memory_space<vmem>>, %arg7: memref<8x4xf32, #tpu.memory_space<vmem>>, %arg8: memref<8x1xf32, #tpu.memory_space<vmem>>, %arg9: memref<1x8x16xf32, #tpu.memory_space<vmem>>, %arg10: memref<4x144xf32, #tpu.memory_space<vmem>>, %arg11: memref<8x144xf32, #tpu.memory_space<vmem>>) attributes {dimension_semantics = [#tpu.dimension_semantics<parallel>, #tpu.dimension_semantics<arbitrary>], iteration_bounds = array<i64: 2, 1>, scalar_prefetch = 0 : i64, scratch_operands = 2 : i64, tpu.core_type = #tpu.core_type<tc>, window_params = [{transform_indices = @transform_0, window_bounds = array<i64: 1, 4, 16>}, {pipeline_mode = #tpu.pipeline_mode<synchronous>, transform_indices = @transform_1, window_bounds = array<i64: 3, 8, 4>}, {pipeline_mode = #tpu.pipeline_mode<synchronous>, transform_indices = @transform_2, window_bounds = array<i64: 8, 1>}, {pipeline_mode = #tpu.pipeline_mode<synchronous>, transform_indices = @transform_3, window_bounds = array<i64: 3, 8, 8>}, {pipeline_mode = #tpu.pipeline_mode<synchronous>, transform_indices = @transform_4, window_bounds = array<i64: 8, 1>}, {pipeline_mode = #tpu.pipeline_mode<synchronous>, transform_indices = @transform_5, window_bounds = array<i64: 8, 4>}, {pipeline_mode = #tpu.pipeline_mode<synchronous>, transform_indices = @transform_6, window_bounds = array<i64: 8, 1>}, {transform_indices = @transform_7, window_bounds = array<i64: 1, 8, 16>}]} {
    %c0 = arith.constant 0 : index
    %c0_0 = arith.constant 0 : index
    %c0_1 = arith.constant 0 : index
    %0 = vector.load %arg2[%c0, %c0_0, %c0_1] : memref<1x4x16xf32, #tpu.memory_space<vmem>>, vector<1x4x16xf32>
    %1 = vector.shape_cast %0 : vector<1x4x16xf32> to vector<4x16xf32>
    %c0_i32 = arith.constant 0 : i32
    %2 = arith.cmpi eq, %arg1, %c0_i32 : i32
    %3 = arith.extui %2 : i1 to i32
    %c0_i32_2 = arith.constant 0 : i32
    %4 = arith.cmpi ne, %3, %c0_i32_2 : i32
    scf.if %4 {
      %cst_51 = arith.constant 0.000000e+00 : f32
      %54 = vector.broadcast %cst_51 : f32 to vector<4x4xf32>
      %c0_52 = arith.constant 0 : index
      %c124_53 = arith.constant 124 : index
      %55 = vector.load %arg10[%c0_52, %c124_53] : memref<4x144xf32, #tpu.memory_space<vmem>>, vector<4x4xf32>
      tpu.vector_store %arg10[%c0_52, %c124_53], %54 {strides = array<i32>} : memref<4x144xf32, #tpu.memory_space<vmem>>, vector<4x4xf32>,
      %cst_54 = arith.constant 0.000000e+00 : f32
      %56 = vector.broadcast %cst_54 : f32 to vector<8x4xf32>
      %c0_55 = arith.constant 0 : index
      %c124_56 = arith.constant 124 : index
      %57 = vector.load %arg11[%c0_55, %c124_56] : memref<8x144xf32, #tpu.memory_space<vmem>>, vector<8x4xf32>
      tpu.vector_store %arg11[%c0_55, %c124_56], %56 {strides = array<i32>} : memref<8x144xf32, #tpu.memory_space<vmem>>, vector<8x4xf32>,
    } else {
    }
    %c0_3 = arith.constant 0 : index
    %c128 = arith.constant 128 : index
    %5 = vector.load %arg10[%c0_3, %c128] : memref<4x144xf32, #tpu.memory_space<vmem>>, vector<4x16xf32>
    tpu.vector_store %arg10[%c0_3, %c128], %1 {strides = array<i32>} : memref<4x144xf32, #tpu.memory_space<vmem>>, vector<4x16xf32>,
    %c0_4 = arith.constant 0 : index
    %c0_5 = arith.constant 0 : index
    %c0_6 = arith.constant 0 : index
    %6 = vector.load %arg3[%c0_4, %c0_5, %c0_6] : memref<3x8x4xf32, #tpu.memory_space<vmem>>, vector<1x8x4xf32>
    %7 = vector.shape_cast %6 : vector<1x8x4xf32> to vector<8x4xf32>
    %c0_7 = arith.constant 0 : index
    %c124 = arith.constant 124 : index
    %8 = vector.load %arg10[%c0_7, %c124] : memref<4x144xf32, #tpu.memory_space<vmem>>, vector<4x16xf32>
    %cst = arith.constant dense<0.000000e+00> : vector<8x16xf32>
    %9 = tpu.matmul %7, %8, %cst {dimension_numbers = #tpu.dot_dimension_numbers<[1], [0], [0], [1], [0, 0, 1, 1], [], []>} : vector<8x4xf32>, vector<4x16xf32>, vector<8x16xf32> -> vector<8x16xf32>
    %c1 = arith.constant 1 : index
    %c0_8 = arith.constant 0 : index
    %c0_9 = arith.constant 0 : index
    %10 = vector.load %arg3[%c1, %c0_8, %c0_9] : memref<3x8x4xf32, #tpu.memory_space<vmem>>, vector<1x8x4xf32>
    %11 = vector.shape_cast %10 : vector<1x8x4xf32> to vector<8x4xf32>
    %c0_10 = arith.constant 0 : index
    %c126 = arith.constant 126 : index
    %12 = vector.load %arg10[%c0_10, %c126] : memref<4x144xf32, #tpu.memory_space<vmem>>, vector<4x16xf32>
    %cst_11 = arith.constant dense<0.000000e+00> : vector<8x16xf32>
    %13 = tpu.matmul %11, %12, %cst_11 {dimension_numbers = #tpu.dot_dimension_numbers<[1], [0], [0], [1], [0, 0, 1, 1], [], []>} : vector<8x4xf32>, vector<4x16xf32>, vector<8x16xf32> -> vector<8x16xf32>
    %14 = arith.addf %9, %13 : vector<8x16xf32>
    %c2 = arith.constant 2 : index
    %c0_12 = arith.constant 0 : index
    %c0_13 = arith.constant 0 : index
    %15 = vector.load %arg3[%c2, %c0_12, %c0_13] : memref<3x8x4xf32, #tpu.memory_space<vmem>>, vector<1x8x4xf32>
    %16 = vector.shape_cast %15 : vector<1x8x4xf32> to vector<8x4xf32>
    %c0_14 = arith.constant 0 : index
    %c128_15 = arith.constant 128 : index
    %17 = vector.load %arg10[%c0_14, %c128_15] : memref<4x144xf32, #tpu.memory_space<vmem>>, vector<4x16xf32>
    %cst_16 = arith.constant dense<0.000000e+00> : vector<8x16xf32>
    %18 = tpu.matmul %16, %17, %cst_16 {dimension_numbers = #tpu.dot_dimension_numbers<[1], [0], [0], [1], [0, 0, 1, 1], [], []>} : vector<8x4xf32>, vector<4x16xf32>, vector<8x16xf32> -> vector<8x16xf32>
    %19 = arith.addf %14, %18 : vector<8x16xf32>
    %c0_17 = arith.constant 0 : index
    %c0_18 = arith.constant 0 : index
    %20 = vector.load %arg4[%c0_17, %c0_18] : memref<8x1xf32, #tpu.memory_space<vmem>>, vector<8x1xf32>
    %21 = vector.broadcast %20 : vector<8x1xf32> to vector<8x16xf32>
    %22 = arith.addf %19, %21 : vector<8x16xf32>
    %cst_19 = arith.constant 0.000000e+00 : f32
    %23 = vector.broadcast %cst_19 : f32 to vector<8x16xf32>
    %24 = arith.maximumf %22, %23 : vector<8x16xf32>
    %c0_20 = arith.constant 0 : index
    %c128_21 = arith.constant 128 : index
    %25 = vector.load %arg11[%c0_20, %c128_21] : memref<8x144xf32, #tpu.memory_space<vmem>>, vector<8x16xf32>
    tpu.vector_store %arg11[%c0_20, %c128_21], %24 {strides = array<i32>} : memref<8x144xf32, #tpu.memory_space<vmem>>, vector<8x16xf32>,
    %c0_22 = arith.constant 0 : index
    %c0_23 = arith.constant 0 : index
    %c0_24 = arith.constant 0 : index
    %26 = vector.load %arg5[%c0_22, %c0_23, %c0_24] : memref<3x8x8xf32, #tpu.memory_space<vmem>>, vector<1x8x8xf32>
    %27 = vector.shape_cast %26 : vector<1x8x8xf32> to vector<8x8xf32>
    %c0_25 = arith.constant 0 : index
    %c124_26 = arith.constant 124 : index
    %28 = vector.load %arg11[%c0_25, %c124_26] : memref<8x144xf32, #tpu.memory_space<vmem>>, vector<8x16xf32>
    %cst_27 = arith.constant dense<0.000000e+00> : vector<8x16xf32>
    %29 = tpu.matmul %27, %28, %cst_27 {dimension_numbers = #tpu.dot_dimension_numbers<[1], [0], [0], [1], [0, 0, 1, 1], [], []>} : vector<8x8xf32>, vector<8x16xf32>, vector<8x16xf32> -> vector<8x16xf32>
    %c1_28 = arith.constant 1 : index
    %c0_29 = arith.constant 0 : index
    %c0_30 = arith.constant 0 : index
    %30 = vector.load %arg5[%c1_28, %c0_29, %c0_30] : memref<3x8x8xf32, #tpu.memory_space<vmem>>, vector<1x8x8xf32>
    %31 = vector.shape_cast %30 : vector<1x8x8xf32> to vector<8x8xf32>
    %c0_31 = arith.constant 0 : index
    %c126_32 = arith.constant 126 : index
    %32 = vector.load %arg11[%c0_31, %c126_32] : memref<8x144xf32, #tpu.memory_space<vmem>>, vector<8x16xf32>
    %cst_33 = arith.constant dense<0.000000e+00> : vector<8x16xf32>
    %33 = tpu.matmul %31, %32, %cst_33 {dimension_numbers = #tpu.dot_dimension_numbers<[1], [0], [0], [1], [0, 0, 1, 1], [], []>} : vector<8x8xf32>, vector<8x16xf32>, vector<8x16xf32> -> vector<8x16xf32>
    %34 = arith.addf %29, %33 : vector<8x16xf32>
    %c2_34 = arith.constant 2 : index
    %c0_35 = arith.constant 0 : index
    %c0_36 = arith.constant 0 : index
    %35 = vector.load %arg5[%c2_34, %c0_35, %c0_36] : memref<3x8x8xf32, #tpu.memory_space<vmem>>, vector<1x8x8xf32>
    %36 = vector.shape_cast %35 : vector<1x8x8xf32> to vector<8x8xf32>
    %c0_37 = arith.constant 0 : index
    %c128_38 = arith.constant 128 : index
    %37 = vector.load %arg11[%c0_37, %c128_38] : memref<8x144xf32, #tpu.memory_space<vmem>>, vector<8x16xf32>
    %cst_39 = arith.constant dense<0.000000e+00> : vector<8x16xf32>
    %38 = tpu.matmul %36, %37, %cst_39 {dimension_numbers = #tpu.dot_dimension_numbers<[1], [0], [0], [1], [0, 0, 1, 1], [], []>} : vector<8x8xf32>, vector<8x16xf32>, vector<8x16xf32> -> vector<8x16xf32>
    %39 = arith.addf %34, %38 : vector<8x16xf32>
    %c0_40 = arith.constant 0 : index
    %c0_41 = arith.constant 0 : index
    %40 = vector.load %arg6[%c0_40, %c0_41] : memref<8x1xf32, #tpu.memory_space<vmem>>, vector<8x1xf32>
    %41 = vector.broadcast %40 : vector<8x1xf32> to vector<8x16xf32>
    %42 = arith.addf %39, %41 : vector<8x16xf32>
    %cst_42 = arith.constant 0.000000e+00 : f32
    %43 = vector.broadcast %cst_42 : f32 to vector<8x16xf32>
    %44 = arith.maximumf %42, %43 : vector<8x16xf32>
    %c0_43 = arith.constant 0 : index
    %c0_44 = arith.constant 0 : index
    %45 = vector.load %arg7[%c0_43, %c0_44] : memref<8x4xf32, #tpu.memory_space<vmem>>, vector<8x4xf32>
    %cst_45 = arith.constant dense<0.000000e+00> : vector<8x16xf32>
    %46 = tpu.matmul %45, %1, %cst_45 {dimension_numbers = #tpu.dot_dimension_numbers<[1], [0], [0], [1], [0, 0, 1, 1], [], []>} : vector<8x4xf32>, vector<4x16xf32>, vector<8x16xf32> -> vector<8x16xf32>
    %c0_46 = arith.constant 0 : index
    %c0_47 = arith.constant 0 : index
    %47 = vector.load %arg8[%c0_46, %c0_47] : memref<8x1xf32, #tpu.memory_space<vmem>>, vector<8x1xf32>
    %48 = vector.broadcast %47 : vector<8x1xf32> to vector<8x16xf32>
    %49 = arith.addf %46, %48 : vector<8x16xf32>
    %50 = arith.addf %44, %49 : vector<8x16xf32>
    %c0_48 = arith.constant 0 : index
    %c0_49 = arith.constant 0 : index
    %c0_50 = arith.constant 0 : index
    %51 = vector.load %arg9[%c0_48, %c0_49, %c0_50] : memref<1x8x16xf32, #tpu.memory_space<vmem>>, vector<1x8x16xf32>
    %52 = vector.shape_cast %51 : vector<1x8x16xf32> to vector<8x16xf32>
    %53 = vector.shape_cast %50 : vector<8x16xf32> to vector<1x8x16xf32>
    tpu.vector_store %arg9[%c0_48, %c0_49, %c0_50], %53 {strides = array<i32>} : memref<1x8x16xf32, #tpu.memory_space<vmem>>, vector<1x8x16xf32>,
    return
  }
  func.func @transform_0(%arg0: i32, %arg1: i32) -> (i32, i32, i32) {
    %c0_i32 = arith.constant 0 : i32
    %c0_i32_0 = arith.constant 0 : i32
    return %arg0, %c0_i32, %arg1 : i32, i32, i32
  }
  func.func @transform_1(%arg0: i32, %arg1: i32) -> (i32, i32, i32) {
    %c0_i32 = arith.constant 0 : i32
    %c0_i32_0 = arith.constant 0 : i32
    %c0_i32_1 = arith.constant 0 : i32
    %c0_i32_2 = arith.constant 0 : i32
    return %c0_i32, %c0_i32_0, %c0_i32_1 : i32, i32, i32
  }
  func.func @transform_2(%arg0: i32, %arg1: i32) -> (i32, i32) {
    %c0_i32 = arith.constant 0 : i32
    %c0_i32_0 = arith.constant 0 : i32
    %c0_i32_1 = arith.constant 0 : i32
    return %c0_i32, %c0_i32_0 : i32, i32
  }
  func.func @transform_3(%arg0: i32, %arg1: i32) -> (i32, i32, i32) {
    %c0_i32 = arith.constant 0 : i32
    %c0_i32_0 = arith.constant 0 : i32
    %c0_i32_1 = arith.constant 0 : i32
    %c0_i32_2 = arith.constant 0 : i32
    return %c0_i32, %c0_i32_0, %c0_i32_1 : i32, i32, i32
  }
  func.func @transform_4(%arg0: i32, %arg1: i32) -> (i32, i32) {
    %c0_i32 = arith.constant 0 : i32
    %c0_i32_0 = arith.constant 0 : i32
    %c0_i32_1 = arith.constant 0 : i32
    return %c0_i32, %c0_i32_0 : i32, i32
  }
  func.func @transform_5(%arg0: i32, %arg1: i32) -> (i32, i32) {
    %c0_i32 = arith.constant 0 : i32
    %c0_i32_0 = arith.constant 0 : i32
    %c0_i32_1 = arith.constant 0 : i32
    return %c0_i32, %c0_i32_0 : i32, i32
  }
  func.func @transform_6(%arg0: i32, %arg1: i32) -> (i32, i32) {
    %c0_i32 = arith.constant 0 : i32
    %c0_i32_0 = arith.constant 0 : i32
    %c0_i32_1 = arith.constant 0 : i32
    return %c0_i32, %c0_i32_0 : i32, i32
  }
  func.func @transform_7(%arg0: i32, %arg1: i32) -> (i32, i32, i32) {
    %c0_i32 = arith.constant 0 : i32
    %c0_i32_0 = arith.constant 0 : i32
    return %arg0, %c0_i32, %arg1 : i32, i32, i32
  }
}

</mosaic_0001>

<bundles_post_ra>
// kernel: tpu_custom_call.1
= control target key start
LH: loop header
LB: loop body
LE: loop exit
PB: predicated region body
PF: predicated region fallthrough
CT: control target
= control target key end

     0   :  { %12 = vsyncpa [#allocation5], 0  ;;  %s1445_s0 = inlined_call_operand.vmem [shape: f32[2,4,16], index: 0, kind: input, shape index: {}]   ;;  %s1446_s1 = inlined_call_operand.vmem [shape: f32[3,8,4], index: 1, kind: input, shape index: {}]   ;;  %s1447_s2 = inlined_call_operand.vmem [shape: f32[8,1], index: 2, kind: input, shape index: {}]   ;;  %s1448_s3 = inlined_call_operand.vmem [shape: f32[3,8,8], index: 3, kind: input, shape index: {}]   ;;  %s1449_s4 = inlined_call_operand.vmem [shape: f32[8,1], index: 4, kind: input, shape index: {}]   ;;  %s1450_s5 = inlined_call_operand.vmem [shape: f32[8,4], index: 5, kind: input, shape index: {}]   ;;  %s1451_s6 = inlined_call_operand.vmem [shape: f32[8,1], index: 6, kind: input, shape index: {}]   ;;  %s1452_s7 = inlined_call_operand.hbm [shape: f32[2,8,16], index: 7, kind: output, shape index: {}]  }
   0x1   :  { %14 = vsyncpa [#allocation5 + $0x1], 0  ;;  %s1254_s24 = smov 0   ;;  %s1256_s25 = smov 0  }
   0x2   :  { %s1258_s26 = smov 0   ;;  %s1260_s27 = smov 0  }
   0x3   :  { %s1262_s28 = smov 0   ;;  %s1264_s29 = smov 0  }
   0x4 LB: > { %s990_s30 = sadd.s32 4294967295, %s1206_s29   ;;  %s991_s8 = sadd.s32 4294967294, %s1206_s29   ;;  %s1206_s29 = sphi %s1264_s29, %s20_s29   ;;  %s1202_s28 = sphi %s1262_s28, %s1459_s28   ;;  %s1198_s27 = sphi %s1260_s27, %s1458_s27   ;;  %s1194_s26 = sphi %s1258_s26, %s1457_s26   ;;  %s1190_s25 = sphi %s1256_s25, %s1456_s25   ;;  %s1186_s24 = sphi %s1254_s24, %s1455_s24  }
   0x5   : > { %s32_s9 = sadd.s32 1, %s1202_s28  ;;  %s195_s10 = sadd.s32 1, %s1194_s26 }
   0x6   : > { %p34_p0 = scmp.ge.s32.totalorder %s32_s9, 2  ;;  %p205_p1 = scmp.ne.s32.totalorder %s1194_s26, %s1190_s25 }
   0x7   : > { %p206_p2 = scmp.eq.s32.totalorder %s990_s30, 1  ;;  %p211_p3 = scmp.ne.s32.totalorder %s1190_s25, %s1186_s24 }
   0x8   : > { %s1461_s9 = smov (%p34_p0, %s32_s9), 0  ;;  %p212_p5 = scmp.eq.s32.totalorder %s991_s8, 1 }
   0x9   : > { %p1294_p4 = por %p206_p2, %p205_p1  ;;  %s190_s12 = ssub.s32 %s1202_s28, %s1461_s9 }
   0xa   : > { %p994_p6 = scmp.ge.s32.totalorder %s1206_s29, 1  ;;  %p193_p7 = scmp.eq.s32.totalorder %s190_s12, 0 }
   0xb   : > { %p1301_p8 = por %p212_p5, %p211_p3  ;;  %p258_p9 = scmp.lt.s32.totalorder %s1206_s29, 3 }
   0xc   : > { %s1307_s14 = scalar_select %p193_p7, %s1194_s26, %s195_s10  }
   0xd   : > { %p259_p10 = pnand %p994_p6, %p258_p9 }
   0xe   : > { %p292_p11 = scmp.lt.s32.totalorder (!%p259_p10), %s1198_s27, 1  ;;  %vm304_vm0 = vcmask (!%p259_p10), 1044448   ;;  %v1208_v0 = vmov (!%p259_p10), 0.0   ;;  %vm308_vm1 = vcmask (!%p259_p10), 125952   ;;  %vm1209_vm2 = vmmov (!%p259_p10), 0   ;;  %s1211_s20 = smov (!%p259_p10), 4  }
   0xf   : > { %262 = sbr.rel (%p259_p10) target bundleno = 743 (0x2e7), region = 48  ;;  %305 = vst.msk [vmem:[#allocation2] sm:$0xf] (!%p259_p10), %vm304_vm0, %v1208_v0  ;;  %1030 = vmatprep.subr.mxu0 (!%p259_p10), %v1208_v0  ;;  %1035 = vmatprep.subr.mxu1 (!%p259_p10), %v1208_v0  ;;  %vm306_vm3 = vcmask (!%p259_p10), 1048544   ;;  %v1210_v2 = vmov (!%p259_p10), 0   ;;  %s1212_s21 = smov (!%p259_p10), 2  }
  0x10   : > { %1032 = vmatprep.mubr.msk.f32.mxu0 (!%p259_p10), %vm1209_vm2, %v1208_v0  ;;  %1037 = vmatprep.mubr.msk.f32.mxu1 (!%p259_p10), %vm1209_vm2, %v1208_v0  ;;  %307 = vst.msk [vmem:[#allocation3] sm:$0xff] (!%p259_p10), %vm306_vm3, %v1208_v0  ;;  %v559_v5 = vld [vmem:[%s1447_s2] sm:$0xff] (!%p259_p10)  ;;  %vm320_vm4 = vcmask (!%p259_p10), 15360   ;;  %vm322_vm5 = vcmask (!%p259_p10), 31744   ;;  %vm326_vm6 = vcmask (!%p259_p10), 1043456   ;;  %v997_v12 = vld [vmem:[%s1446_s1 + $0x8] sm:$0xff] (!%p259_p10) }
  0x11   : > { %1125 = vset.pattern.permute.xlu0 (!%p259_p10), %v1210_v2  ;;  %1126 = vset.pattern.permute.xlu1 (!%p259_p10), %v1210_v2  ;;  %v811_v7 = vld [vmem:[%s1449_s4] sm:$0xff] (!%p259_p10)  ;;  %v1002_v17 = vld [vmem:[%s1446_s1 + $0x10] sm:$0xff] (!%p259_p10)  ;;  %vm567_vm7 = vcmask (!%p259_p10), 130048   ;;  %v1005_v33 = vld [vmem:[%s1448_s3 + $0x8] sm:$0xff] (!%p259_p10)  ;;  %vm582_vm8 = vcmask (!%p259_p10), 64512   ;;  %s1013_s18 = sshll.u32 (!%p259_p10), %s1198_s27, 7 }
  0x12   : > { %v310_v13 = vld [vmem:[%s1446_s1] sm:$0xff] (!%p259_p10)  ;;  %v1008_v38 = vld [vmem:[%s1448_s3 + $0x10] sm:$0xff] (!%p259_p10) }
  0x13   : > { %v820_v30 = vld [vmem:[%s1451_s6] sm:$0xff] (!%p259_p10) }
  0x14   : > { %v569_v37 = vld [vmem:[%s1448_s3] sm:$0xff] (!%p259_p10) }
  0x15   : > { %v819_v40 = vld [vmem:[%s1450_s5] sm:$0xff] (!%p259_p10) }
  0x16   : > { %s293_s15 = scalar_select %p292_p11, %s1198_s27, 1 }
  0x17   : > { %v570_v6 = vld [vmem:[#allocation3] sm:$0xff]  ;;  %s1213_s27 = smov [#allocation4]  }
  0x18   : > { %s996_s16 = sshll.u32 %s293_s15, 2  ;;  %s1132_s10 = sshll.u32 %s1213_s27, 4  ;;  %s1133_s10 = int_to_ptr.vmem [resolvable:$false] %s1132_s10 }
  0x19   : > { %s298_s19 = scalar_lea.vmem %s1445_s0, %s996_s16  ;;  %s289_s16 = sand.u32 1, %s1190_s25  }
  0x1a   : > { %v1317_v1 = vld [vmem:[%s298_s19] sm:$0xf]  ;;  %s995_s17 = sshll.u32 %s289_s16, 3  ;;  %s1134_s12 = scalar_lea.vmem %s1133_s10, 256 }
  0x1b   : > { %309 = vst.msk [vmem:[#allocation2 + $0x4] sm:$0xf] %vm308_vm1, %v1317_v1  ;;  %s291_s19 = scalar_lea.vmem [#allocation4], %s995_s17 }
  0x1c   : > { %s919_s22 = sshll.u32 %s291_s19, 4  ;;  %s1399_s22 = int_to_ptr.vmem [resolvable:$true] %s919_s22 }
  0x1d   : > { %s1128_s8 = scalar_lea.vmem %s1399_s22, 128  ;;  %p1135_p1 = scmp.lt.s32.totalorder %s1399_s22, %s1133_s10 }
  0x1e   : > { %p1129_p12 = scmp.ne.s32.totalorder %s1399_s22, %s1128_s8  ;;  %p1136_p2 = scmp.lt.s32.totalorder %s1134_s12, %s1128_s8 }
  0x20   : > { %p1130_p13 = pnand %p1129_p12, %p1294_p4  ;;  %p1137_p3 = por %p1136_p2, %p1135_p1 }
  0x22   : > { %v311_v3 = vld [vmem:[#allocation2] sm:$0xff]  ;;  %p1131_p0 = pneg %p1130_p13 }
  0x23   : > { %399 = vrot.lane.b32.xlu1 %v311_v3, %s1211_s20  ;;  %316 = vrot.lane.b32.xlu0 %v311_v3, %s1212_s21  ;;  %v315_v4 = vcombine.high %v311_v3, %v311_v3  ;;  %v481_v16 = vld [vmem:[#allocation2 + $0x4] sm:$0xf] }
  0x24   : > { %p1138_p5 = pnand %p1137_p3, %p1131_p0 }
  0x27   : > { %401 = vrot.lane.b32.xlu1 %v315_v4, %s1211_s20  ;;  %318 = vrot.lane.b32.xlu0 %v315_v4, %s1212_s21 }
  0x2b   : > { %562 = vperm.xlu0 %1125, %v559_v5   ;;  %576 = vrot.lane.b32.xlu1 %v570_v6, %s1212_s21 }
  0x2f   : > { %656 = vrot.lane.b32.xlu0 %v570_v6, %s1211_s20 }
  0x33   : > { %814 = vperm.xlu0 %1125, %v811_v7  }
  0x95   : > { %v400_v8 = vpop.permute.xlu1 %399  ;;  %v317_v9 = vpop.permute.xlu0 %316 }
  0x99   : > { %v402_v10 = vpop.permute.xlu1 %401  ;;  %v319_v11 = vpop.permute.xlu0 %318 }
  0x9a   : > { %v321_v14 = vsel %vm320_vm4, %v317_v9, %v319_v11  ;;  %v403_v15 = vsel %vm322_vm5, %v400_v8, %v402_v10 }
  0x9b   : > { %1031 = vmatpush3.msk.msra.mxu0 %vm326_vm6, %v321_v14  ;;  %1036 = vmatpush3.msk.msra.mxu1 %vm326_vm6, %v403_v15 }
  0x9c   : > { %1033 = vmatmul.mubr.msk.f32.vlgmr.msra.gmra.mrb[0].mxu0 %vm322_vm5, %v997_v12  ;;  %1038 = vmatmul.mubr.msk.f32.vlgmr.msra.gmra.mrb[0].mxu1 %vm322_vm5, %v310_v13 }
  0x9d   : > { %1040 = vmatprep.subr.mxu0 %v1208_v0  ;;  %1042 = vmatprep.mubr.msk.f32.mxu0 %vm1209_vm2, %v1208_v0  ;;  %v577_v31 = vpop.permute.xlu1 %576 }
  0x9e   : > { %1041 = vmatpush3.msk.msra.mxu0 %vm326_vm6, %v481_v16  ;;  %1045 = vmatprep.subr.mxu1 %v1208_v0 }
  0x9f   : > { %1047 = vmatprep.mubr.msk.f32.mxu1 %vm1209_vm2, %v1208_v0  ;;  %1050 = vmatprep.subr.mxu0 %v1208_v0 }
  0xa0   : > { %1043 = vmatmul.mubr.msk.f32.vlgmr.msra.gmra.mrb[2].mxu0 %vm322_vm5, %v1002_v17 }
  0xa1   : > { %1052 = vmatprep.mubr.msk.f32.mxu0 %vm1209_vm2, %v1208_v0 }
  0xaa   : > { %v563_v26 = vpop.permute.xlu0 %562 }
  0xae   : > { %v657_v35 = vpop.permute.xlu0 %656 }
  0xb2   : > { %v815_v50 = vpop.permute.xlu0 %814 }
 0x16f   : > { %v395_v18 = vpop.f32.mrb[0].mxu0  ;;  %v475_v19 = vpop.f32.mrb[0].mxu1 }
 0x170   : > { %v476_v20 = vadd.f32 %v475_v19, %v395_v18  ;;  %v1034_v21 = vpop.f32.mrb[1].mxu0  ;;  %v1039_v22 = vpop.f32.mrb[1].mxu1 }
 0x173   : > { %v554_v23 = vpop.f32.mrb[2].mxu0 }
 0x174   : > { %v558_v24 = vadd.f32 %v554_v23, %v476_v20  ;;  %v1044_v25 = vpop.f32.mrb[3].mxu0 }
 0x176   : > { %v565_v27 = vadd.f32 %v563_v26, %v558_v24 }
 0x178   : > { %v566_v28 = vmax.f32 %v565_v27, 0.0 }
 0x17a   : > { %568 = vst.msk [vmem:[#allocation3 + $0x8] sm:$0xff] %vm567_vm7, %v566_v28 }
 0x181   : > { %v571_v29 = vld [vmem:[#allocation3 + $0x8] sm:$0xff] }
 0x182   : > { %578 = vrot.lane.b32.xlu1 %v571_v29, %s1212_s21  ;;  %s905_s21 = scalar_lea.sflag [#allocation5], %s289_s16 }
 0x186   : > { %658 = vrot.lane.b32.xlu1 %v571_v29, %s1211_s20  ;;  %s1397_s20 = scalar_lea.hbm %s1452_s7, %s1013_s18 }
 0x18a   : > { %823 = vperm.xlu1 %1126, %v820_v30  }
 0x1f4   : > { %v579_v32 = vpop.permute.xlu1 %578 }
 0x1f5   : > { %v580_v34 = vsel %vm320_vm4, %v577_v31, %v579_v32 }
 0x1f6   : > { %1046 = vmatpush3.msra.mxu1 %v580_v34 }
 0x1f7   : > { %1055 = vmatprep.subr.mxu1 %v1208_v0  ;;  %1048 = vmatmul.mubr.msk.f32.vlgmr.msra.gmra.mrb[2].mxu1 %vm582_vm8, %v1005_v33 }
 0x1f8   : > { %1056 = vmatpush3.msra.mxu1 %v571_v29  ;;  %v659_v36 = vpop.permute.xlu1 %658  ;;  %1057 = vmatprep.mubr.msk.f32.mxu1 %vm1209_vm2, %v1208_v0 }
 0x1f9   : > { %v660_v39 = vsel %vm322_vm5, %v657_v35, %v659_v36 }
 0x1fa   : > { %1051 = vmatpush3.msra.mxu0 %v660_v39 }
 0x1fb   : > { %1053 = vmatmul.mubr.msk.f32.vlgmr.msra.gmra.mrb[4].mxu0 %vm582_vm8, %v569_v37  ;;  %1058 = vmatmul.mubr.msk.f32.vlgmr.msra.gmra.mrb[4].mxu1 %vm582_vm8, %v1008_v38 }
 0x1fc   : > { %1060 = vmatprep.subr.mxu0 %v1208_v0  ;;  %1062 = vmatprep.mubr.msk.f32.mxu0 %vm1209_vm2, %v1208_v0 }
 0x1fd   : > { %1061 = vmatpush3.msk.msra.mxu0 %vm326_vm6, %v1317_v1 }
 0x1ff   : > { %1063 = vmatmul.mubr.msk.f32.vlgmr.msra.gmra.mrb[6].mxu0 %vm322_vm5, %v819_v40 }
 0x209   : > { %v824_v48 = vpop.permute.xlu1 %823 }
 0x2ca   : > { %v652_v41 = vpop.f32.mrb[2].mxu1 }
 0x2cb   : > { %v1049_v42 = vpop.f32.mrb[3].mxu1 }
 0x2ce   : > { %v731_v43 = vpop.f32.mrb[4].mxu0  ;;  %v806_v44 = vpop.f32.mrb[4].mxu1 }
 0x2cf   : > { %v732_v45 = vadd.f32 %v731_v43, %v652_v41  ;;  %v1054_v46 = vpop.f32.mrb[5].mxu0  ;;  %v1059_v47 = vpop.f32.mrb[5].mxu1 }
 0x2d1   : > { %v810_v49 = vadd.f32 %v806_v44, %v732_v45 }
 0x2d2   : > { %v898_v51 = vpop.f32.mrb[6].mxu0 }
 0x2d3   : > { %v817_v52 = vadd.f32 %v815_v50, %v810_v49  ;;  %v899_v53 = vadd.f32 %v898_v51, %v824_v48  ;;  %v1064_v54 = vpop.f32.mrb[7].mxu0 }
 0x2d5   : > { %v818_v55 = vmax.f32 %v817_v52, 0.0 }
 0x2d7   : > { %v902_v56 = vadd.f32 %v899_v53, %v818_v55 }
 0x2d9   : > { %903 = vst.msk [vmem:[%s291_s19] sm:$0xff] %vm567_vm7, %v902_v56 }
 0x2da   : > { %1141 = shalt.err (!%p1138_p5)
}
 0x2db   : > { %s1142_s15 = scalar_lea.hbm %s1397_s20, 128  ;;  %s1146_s18 = scalar_lea.hbm %s1452_s7, 256 }
 0x2dc   : > { %p1143_p6 = scmp.ne.s32.totalorder %s1397_s20, %s1142_s15  ;;  %p1147_p10 = scmp.lt.u32.totalorder %s1397_s20, %s1452_s7 }
 0x2dd   : > { %p1148_p11 = scmp.lt.u32.totalorder %s1146_s18, %s1142_s15  ;;  %p1150_p13 = scmp.lt.u32.totalorder %s1142_s15, %s1397_s20 }
 0x2de   : > { %p1144_p7 = pnand %p1143_p6, %p1294_p4 }
 0x2df   : > { %p1149_p12 = por %p1148_p11, %p1147_p10 }
 0x2e0   : > { %p1145_p9 = pneg %p1144_p7 }
 0x2e1   : > { %p1151_p0 = por %p1150_p13, %p1149_p12 }
 0x2e3   : > { %p1152_p1 = pnand %p1151_p0, %p1145_p9 }
 0x2e5   : > { %1155 = shalt.err (!%p1152_p1)
}
 0x2e6   : > { %1065 = dma.vmem_to_hbm [thread:$0]  (%p1294_p4), %s1399_s22, 128, %s1397_s20, %s905_s21  }
 0x2e7 PF: > { %p1071_p2 = scmp.ge.s32.totalorder %s1206_s29, 2  ;;  %s931_s30 = sand.u32 1, %s1186_s24  }
 0x2e8   : > { %s932_s8 = scalar_lea.sflag [#allocation5], %s931_s30 }
 0x2e9   : > { %p1068_p3 = pnand %p1071_p2, %p1301_p8 }
 0x2eb   : > { %1181 = dma.done.wait (!%p1068_p3), %s932_s8, 128  }
 0x2ec   : > { %1183 = vsyncadd (!%p1068_p3), %s932_s8, 4294967168  ;;  %s20_s29 = sadd.s32 1, %s1206_s29   ;;  %s1455_s24 = smov %s1190_s25 }
 0x2ed   : > { %p17_p5 = scmp.ge.s32.totalorder %s20_s29, 4   ;;  %s1456_s25 = smov %s1194_s26 }
 0x2ee   : > { %s1457_s26 = smov %s1307_s14  ;;  %s1458_s27 = smov %s1202_s28 }
 0x2ef   : > { %s1459_s28 = smov %s1461_s9  ;;  %19 = sbr.rel (!%p17_p5) target bundleno = 4 (0x4), region = 91 }
 0x2f6   :  { %937 = vsyncpa [#allocation5], 1 }
 0x2f7   :  { %939 = vsyncpa [#allocation5 + $0x1], 1 }

</bundles_post_ra>
